<compile_context>
chip_gen: v7x
topology: tpu7x:2x2x1
jax: 0.10.0
libtpu: 0.0.40
codegen_flags: <defaults>
</compile_context>

<pallas_src>
import functools

import jax
import jax.numpy as jnp
from jax import lax
from jax.experimental import pallas as pl
from jax.experimental.pallas import tpu as pltpu


# ---------------------------------------------------------------------------
# Small helpers
# ---------------------------------------------------------------------------
def _round_up(n, m):
    return ((n + m - 1) // m) * m


# ---------------------------------------------------------------------------
# Pallas kernels
# ---------------------------------------------------------------------------
def _enc_head_kernel(x_ref, w1t_ref, b1_ref, ws_ref, bs_ref, o_ref):
    """score = ws . relu(w1^T x + b1) + bs  (lane-major over spatial positions).

    x_ref  : (1, C, T) f32  image block, T spatial positions on the lane axis
    w1t_ref: (F, C)   f32   encoder 1x1-conv weight, transposed
    b1_ref : (F, 1)   f32
    ws_ref : (F, 1)   f32   detection-head score column
    bs_ref : (1, 1)   f32
    o_ref  : (1, 1, T) f32  score logits (lane-dense store, 4 B / position)
    """
    x = x_ref[0]                       # (C, T)
    w1t = w1t_ref[...]                 # (F, C)
    n_ch = x.shape[0]
    # K is tiny (3 channels): VPU broadcast-FMA instead of a degenerate MXU dot.
    h = w1t[:, 0:1] * x[0:1, :]
    for c in range(1, n_ch):
        h = h + w1t[:, c:c + 1] * x[c:c + 1, :]
    h = jnp.maximum(h + b1_ref[...], 0.0)                       # (F, T), VPU
    s = jnp.sum(h * ws_ref[...], axis=0, keepdims=True) + bs_ref[...]  # XLU reduce
    o_ref[0] = s


def enc_head_score_pallas(x, w1t, b1_col, ws_col, bs11):
    """x: (B, C, HW) f32 -> score logits (B, HW) f32."""
    B, C, HW = x.shape
    T = min(1024, _round_up(HW, 128))          # large lane tile, >=2 grid blocks via B
    HWp = _round_up(HW, T)
    if HWp != HW:
        x = jnp.pad(x, ((0, 0), (0, 0), (0, HWp - HW)))
    F = w1t.shape[0]
    out = pl.pallas_call(
        _enc_head_kernel,
        out_shape=jax.ShapeDtypeStruct((B, 1, HWp), jnp.float32),
        grid=(B, HWp // T),
        in_specs=[
            pl.BlockSpec((1, C, T), lambda b, j: (b, 0, j)),
            pl.BlockSpec((F, C), lambda b, j: (0, 0)),
            pl.BlockSpec((F, 1), lambda b, j: (0, 0)),
            pl.BlockSpec((F, 1), lambda b, j: (0, 0)),
            pl.BlockSpec((1, 1), lambda b, j: (0, 0)),
        ],
        out_specs=pl.BlockSpec((1, 1, T), lambda b, j: (b, 0, j)),
        compiler_params=pltpu.CompilerParams(
            dimension_semantics=("parallel", "parallel")),
        cost_estimate=pl.CostEstimate(
            flops=int(2 * B * HWp * F * (C + 1)),
            transcendentals=0,
            bytes_accessed=int(4 * (B * C * HWp + B * HWp + F * (C + 3)))),
    )(x, w1t, b1_col, ws_col, bs11)
    return out[:, 0, :HW]


def _refine_score_kernel(x_ref, w1_ref, b1_ref, w2_ref, b2_ref, o_ref, s_ref,
                         *, d_half, inv_n):
    """Fused 2-layer refiner MLP (bf16 MXU / f32 acc) + per-row render MSE.

    Row layout of x: [crop | 0pad][render | 0pad], each half d_half lanes wide
    (128-aligned), so the MSE is a cheap half-vs-half slice of data the MXU
    pass already loaded -- no second HBM read, no extra kernel launch.
    """
    x = x_ref[...]                                         # (tm, 2*d_half) f32
    xb = x.astype(jnp.bfloat16)
    h = jnp.dot(xb, w1_ref[...], preferred_element_type=jnp.float32)
    h = jnp.maximum(h + b1_ref[...], 0.0)
    o = jnp.dot(h.astype(jnp.bfloat16), w2_ref[...],
                preferred_element_type=jnp.float32)
    o_ref[...] = o + b2_ref[...]
    d = x[:, :d_half] - x[:, d_half:]
    s_ref[...] = jnp.sum(d * d, axis=1, keepdims=True) * inv_n


def refine_and_score_pallas(x, w1, b1, w2, b2, *, d_half, mse_elems):
    """x: (N, 2*d_half) f32 -> (refiner out (N, 128) f32, mse (N,) f32)."""
    N, Kp = x.shape
    hidden = w1.shape[1]
    n_out = w2.shape[1]
    tm = min(256, max(8, _round_up((N + 1) // 2, 8)))      # >=2 grid blocks (v7x)
    Np = _round_up(N, tm)
    if Np != N:
        x = jnp.pad(x, ((0, Np - N), (0, 0)))
    o, s = pl.pallas_call(
        functools.partial(_refine_score_kernel, d_half=d_half,
                          inv_n=1.0 / float(mse_elems)),
        out_shape=(jax.ShapeDtypeStruct((Np, n_out), jnp.float32),
                   jax.ShapeDtypeStruct((Np, 1), jnp.float32)),
        grid=(Np // tm,),
        in_specs=[
            pl.BlockSpec((tm, Kp), lambda i: (i, 0)),
            pl.BlockSpec((Kp, hidden), lambda i: (0, 0)),
            pl.BlockSpec((1, hidden), lambda i: (0, 0)),
            pl.BlockSpec((hidden, n_out), lambda i: (0, 0)),
            pl.BlockSpec((1, n_out), lambda i: (0, 0)),
        ],
        out_specs=(pl.BlockSpec((tm, n_out), lambda i: (i, 0)),
                   pl.BlockSpec((tm, 1), lambda i: (i, 0))),
        compiler_params=pltpu.CompilerParams(
            dimension_semantics=("parallel",)),
        cost_estimate=pl.CostEstimate(
            flops=int(2 * Np * (Kp * hidden + hidden * n_out) + 3 * Np * d_half),
            transcendentals=0,
            bytes_accessed=int(4 * Np * Kp + 2 * (Kp * hidden + hidden * n_out)
                               + 4 * Np * (n_out + 1))),
    )(x, w1, b1, w2, b2)
    return o[:N], s[:N, 0]


# ---------------------------------------------------------------------------
# Plain-JAX glue: vectorized proposal decode (top-k + crops)
# ---------------------------------------------------------------------------
def decode_proposals(score_logits, images, top_k, crop):
    """score_logits: (B,H,W); images: (B,C,H,W) -> crops (B,top_k,C,crop,crop)."""
    B, H, W = score_logits.shape
    C = images.shape[1]
    score = jax.nn.sigmoid(score_logits)
    vals, idxs = lax.top_k(score.reshape(B, H * W), top_k)
    y = idxs // W
    x = idxs % W
    half = crop // 2
    ys = jnp.clip(y - half, 0, H - crop).astype(jnp.int32)
    xs = jnp.clip(x - half, 0, W - crop).astype(jnp.int32)

    def crop_one(img, yy, xx):
        return lax.dynamic_slice(img, (jnp.int32(0), yy, xx), (C, crop, crop))

    crops = jax.vmap(
        lambda img, ys_b, xs_b: jax.vmap(
            lambda yy, xx: crop_one(img, yy, xx))(ys_b, xs_b)
    )(images, ys, xs)                                       # (B, top_k, C, crop, crop)

    bbox = jnp.stack([x - half, y - half, x + half, y + half],
                     axis=-1).astype(jnp.float32)           # (B, top_k, 4)
    return crops, bbox, vals


# ---------------------------------------------------------------------------
# Sub-modules (deterministic synthetic parameters)
# ---------------------------------------------------------------------------
class ResNetFeatureEncoder:
    """Stand-in ResNet stem: pointwise conv in_ch -> out_dim + ReLU."""
    # TODO(synk): a full pretrained ResNet backbone is out of scope here.

    def __init__(self, key, in_ch, out_dim):
        self.w = jax.random.normal(key, (in_ch, out_dim), jnp.float32) / jnp.sqrt(in_ch)
        self.b = jnp.zeros((out_dim,), jnp.float32)
        self.in_ch = in_ch
        self.out_dim = out_dim


class CandidatePoseModel:
    """1x1 conv head: feature_dim -> 1 (score) + 4 (quat) + 3 (trans)."""

    def __init__(self, key, feature_dim):
        self.w = jax.random.normal(key, (feature_dim, 8), jnp.float32) / jnp.sqrt(feature_dim)
        self.b = jnp.zeros((8,), jnp.float32)


class PoseRefiner:
    """MLP over concatenated (real crop, CAD render) -> delta_R (3x3), delta_t (1x3)."""

    def __init__(self, key, in_dim, hidden=64):
        k1, k2 = jax.random.split(key)
        self.w1 = jax.random.normal(k1, (in_dim, hidden), jnp.float32) / jnp.sqrt(in_dim)
        self.b1 = jnp.zeros((hidden,), jnp.float32)
        self.w2 = jax.random.normal(k2, (hidden, 12), jnp.float32) / jnp.sqrt(hidden)
        self.b2 = jnp.zeros((12,), jnp.float32)
        self.in_dim = in_dim
        self.hidden = hidden


class RenderBank:
    """Deterministic synthetic stand-in for KaolinRenderer CAD templates."""
    # TODO(synk): actual CAD mesh rasterization has no clean Pallas equivalent;
    # templates are deterministic synthetic renders + canonical render poses.

    def __init__(self, cad_models, render_size=8, n_templates=2, distance=3.0):
        self.templates = {}
        for i, cad_id in enumerate(sorted(cad_models.keys())):
            tmpl = []
            for t in range(n_templates):
                key = jax.random.PRNGKey(1000 + 17 * i + t)
                render = jax.random.uniform(
                    key, (1, render_size, render_size, 3), jnp.float32)
                theta = (t + 1) * jnp.pi / 4
                c, s = jnp.cos(theta), jnp.sin(theta)
                R = jnp.array([[c, -s, 0.0], [s, c, 0.0], [0.0, 0.0, 1.0]], jnp.float32)
                pose = jnp.eye(4, dtype=jnp.float32)
                pose = pose.at[:3, :3].set(R)
                pose = pose.at[:3, 3].set(jnp.array([0.0, 0.0, distance], jnp.float32))
                tmpl.append((render, pose))
            self.templates[cad_id] = tmpl

    def get_templates(self, cad_id):
        return self.templates[cad_id]


# ---------------------------------------------------------------------------
# MegaPoseEstimator
# ---------------------------------------------------------------------------
class MegaPoseEstimator:
    def __init__(
        self,
        cad_models,
        encoder_type="resnet",
        sensory_channels=None,
        out_dim=64,
        renderer_params=None,
        distance=3.0,
        K=None,
        crop_size=8,
        render_size=8,
    ):
        if encoder_type != "resnet":
            raise ValueError("Only 'resnet' encoder implemented in Pallas port")
        self.out_dim = out_dim
        self.crop_size = crop_size
        self.render_size = render_size
        in_ch = sensory_channels[list(sensory_channels.keys())[0]]
        self.in_ch = in_ch

        k_enc, k_det, k_ref = jax.random.split(jax.random.PRNGKey(42), 3)
        self.encoder = ResNetFeatureEncoder(k_enc, in_ch, out_dim)
        self.det_head = CandidatePoseModel(k_det, out_dim)

        # Refiner consumes the image crop + the CAD render at crop resolution.
        D = in_ch * crop_size * crop_size            # crop half (NCHW flatten)
        Dr = 3 * crop_size * crop_size               # render half (NCHW flatten)
        self.refiner = PoseRefiner(k_ref, D + Dr)
        self.render_bank = RenderBank(
            cad_models, render_size=render_size, distance=distance)

        # ---- kernel-ready parameters ---------------------------------------
        # Fused encoder+score kernel: transposed encoder weight, column biases,
        # and ONLY the score column of the detection head (quat/trans channels
        # never feed the refined pose in the original forward pass).
        self._w_enc_t = jnp.asarray(self.encoder.w.T)                 # (F, C) f32
        self._b_enc_col = self.encoder.b.reshape(out_dim, 1)          # (F, 1)
        self._w_score_col = self.det_head.w[:, 0:1]                   # (F, 1)
        self._b_score = self.det_head.b[0:1].reshape(1, 1)            # (1, 1)

        # Fused refiner+MSE kernel: both halves 128-lane aligned; weight rows
        # are remapped to the padded layout once here (host side).
        Dh = _round_up(max(D, Dr), 128)
        Kp = 2 * Dh
        hidden = self.refiner.hidden
        w1p = jnp.zeros((Kp, hidden), jnp.float32)
        w1p = w1p.at[:D].set(self.refiner.w1[:D])
        w1p = w1p.at[Dh:Dh + Dr].set(self.refiner.w1[D:D + Dr])
        self._w_ref1 = w1p.astype(jnp.bfloat16)
        self._b_ref1 = self.refiner.b1.reshape(1, hidden)
        n_out = 128                                   # lane-dense output (12 real cols)
        w2p = jnp.zeros((hidden, n_out), jnp.float32).at[:, :12].set(self.refiner.w2)
        b2p = jnp.zeros((n_out,), jnp.float32).at[:12].set(self.refiner.b2)
        self._w_ref2 = w2p.astype(jnp.bfloat16)
        self._b_ref2 = b2p.reshape(1, n_out)
        self._d_half = Dh
        self._mse_elems = D                            # F.mse_loss normalization

        # Build the jitted core ONCE; jax.jit caches compilations per
        # (shapes, static top_k), so repeated forward() calls do not retrace.
        self._core_jit = jax.jit(self._core, static_argnames=("top_k",))

    # -----------------------------------------------------------------------
    def _core(self, images, renders, poses, valid, *, top_k):
        B, C, H, W = images.shape
        crop = self.crop_size
        max_pairs = renders.shape[1]
        HW = H * W

        # -- fused encoder + detection-head score (one Pallas call) ----------
        score_logits = enc_head_score_pallas(
            images.reshape(B, C, HW),
            self._w_enc_t, self._b_enc_col, self._w_score_col, self._b_score)
        score_logits = score_logits.reshape(B, H, W)

        # -- vectorized proposal decode (plain-JAX glue) ----------------------
        crops, bboxes, _det_scores = decode_proposals(score_logits, images, top_k, crop)

        # -- CAD renders -> NCHW at crop resolution ---------------------------
        r = jnp.transpose(renders, (0, 1, 4, 2, 3))        # (B, P, 3, Hr, Wr)
        if r.shape[-2:] != (crop, crop):
            # TODO(synk): bilinear resize glue -- no clean Pallas equivalent
            r = jax.image.resize(r, r.shape[:3] + (crop, crop), method="bilinear")

        # -- build fused refiner+MSE rows: [crop|0pad][render|0pad] -----------
        D = C * crop * crop
        Dr = 3 * crop * crop
        Dh = self._d_half
        crop_half = jnp.pad(crops.reshape(B, top_k, D), ((0, 0), (0, 0), (0, Dh - D)))
        rend_half = jnp.pad(r.reshape(B, max_pairs, Dr), ((0, 0), (0, 0), (0, Dh - Dr)))
        n_combo = B * top_k * max_pairs
        x_rows = jnp.concatenate([
            jnp.broadcast_to(crop_half[:, :, None, :], (B, top_k, max_pairs, Dh)),
            jnp.broadcast_to(rend_half[:, None, :, :], (B, top_k, max_pairs, Dh)),
        ], axis=-1).reshape(n_combo, 2 * Dh)

        # -- batched refiner MLP + render-matching MSE (one Pallas call) ------
        ref_out, mse = refine_and_score_pallas(
            x_rows, self._w_ref1, self._b_ref1, self._w_ref2, self._b_ref2,
            d_half=Dh, mse_elems=self._mse_elems)
        delta_R = jnp.eye(3, dtype=jnp.float32) + 0.1 * jnp.tanh(
            ref_out[:, :9].reshape(n_combo, 3, 3))
        delta_t = 0.01 * jnp.tanh(ref_out[:, 9:12])

        # -- pose composition (tiny 4x4 glue) ---------------------------------
        delta_pose = jnp.tile(jnp.eye(4, dtype=jnp.float32), (n_combo, 1, 1))
        delta_pose = delta_pose.at[:, :3, :3].set(delta_R)
        delta_pose = delta_pose.at[:, :3, 3].set(delta_t)
        base = jnp.broadcast_to(
            poses[:, None], (B, top_k, max_pairs, 4, 4)).reshape(n_combo, 4, 4)
        refined = jnp.einsum("nij,njk->nik", delta_pose, base).reshape(
            B, top_k, max_pairs, 4, 4)

        # -- batched best-template selection per proposal ---------------------
        scores = mse.reshape(B, top_k, max_pairs)
        scores = jnp.where(valid[:, None, :], scores, jnp.inf)
        best_idx = jnp.argmin(scores, axis=-1)                       # (B, top_k)
        best_score = jnp.min(scores, axis=-1)
        best_pose = jnp.take_along_axis(
            refined, best_idx[..., None, None, None], axis=2)[:, :, 0]
        return bboxes, best_pose, best_score

    # -----------------------------------------------------------------------
    def forward(self, images, candidate_cad_ids, top_k=10):
        B, C, H, W = images.shape
        assert C == self.in_ch, "channel count must match sensory_channels"

        # Regularize the (image x CAD x template) structure so everything is
        # batched on device: pad to max_pairs with dummy entries + valid mask.
        per_image_pairs = []
        for b in range(B):
            pairs = []
            for cad_id in candidate_cad_ids[b]:
                pairs.extend(self.render_bank.get_templates(cad_id))
            if not pairs:
                raise ValueError("each image needs at least one CAD template")
            per_image_pairs.append(pairs)
        max_pairs = max(len(p) for p in per_image_pairs)

        zero_render = jnp.zeros((self.render_size, self.render_size, 3), jnp.float32)
        eye4 = jnp.eye(4, dtype=jnp.float32)
        renders, poses, valid = [], [], []
        for pairs in per_image_pairs:
            pad = max_pairs - len(pairs)
            renders.append(jnp.stack([p[0][0] for p in pairs] + [zero_render] * pad))
            poses.append(jnp.stack([p[1] for p in pairs] + [eye4] * pad))
            valid.append([True] * len(pairs) + [False] * pad)
        renders = jnp.stack(renders)                      # (B, P, Hr, Wr, 3)
        poses = jnp.stack(poses)                          # (B, P, 4, 4)
        valid = jnp.asarray(valid, dtype=bool)            # (B, P)

        bboxes, best_poses, best_scores = self._core_jit(
            images, renders, poses, valid, top_k=top_k)

        # ---- host-side result assembly (single device_get for scores) -------
        best_scores_host = jax.device_get(best_scores)
        pose_estimations = []
        for b in range(B):
            image_results = []
            for k in range(top_k):
                image_results.append({
                    "bbox": bboxes[b, k],
                    "refined_pose": best_poses[b, k],
                    "score": float(best_scores_host[b, k]),
                })
            pose_estimations.append(image_results)
        return pose_estimations


# ---------------------------------------------------------------------------
# Main
# ---------------------------------------------------------------------------
if __name__ == "__main__":
    key = jax.random.PRNGKey(0)
    B, C, H, W = 2, 3, 16, 16
    images = jax.random.uniform(key, (B, C, H, W), jnp.float32)

    cad_models = {
        "obj_a": {"verts": None, "faces": None},
        "obj_b": {"verts": None, "faces": None},
    }
    candidate_cad_ids = [["obj_a", "obj_b"], ["obj_a"]]

    model = MegaPoseEstimator(
        cad_models,
        encoder_type="resnet",
        sensory_channels={"rgb": C},
        out_dim=32,
        distance=3.0,
        crop_size=8,
        render_size=8,
    )

    results = model.forward(images, candidate_cad_ids, top_k=2)

    # Block on all outputs.
    for image_results in results:
        for r in image_results:
            jax.block_until_ready(r["refined_pose"])
            jax.block_until_ready(r["bbox"])

    print("KERNEL_OK")
</pallas_src>

<mosaic_0001>
module attributes {stable_mosaic.version = 11 : i64} {
  func.func @_enc_head_kernel(%arg0: i32, %arg1: i32, %arg2: memref<1x3x256xf32, #tpu.memory_space<vmem>>, %arg3: memref<32x3xf32, #tpu.memory_space<vmem>>, %arg4: memref<32x1xf32, #tpu.memory_space<vmem>>, %arg5: memref<32x1xf32, #tpu.memory_space<vmem>>, %arg6: memref<1x1xf32, #tpu.memory_space<vmem>>, %arg7: memref<1x1x256xf32, #tpu.memory_space<vmem>>) attributes {dimension_semantics = [#tpu.dimension_semantics<parallel>, #tpu.dimension_semantics<parallel>], iteration_bounds = array<i64: 2, 1>, scalar_prefetch = 0 : i64, scratch_operands = 0 : i64, tpu.core_type = #tpu.core_type<tc>, window_params = [{transform_indices = @transform_0, window_bounds = array<i64: 1, 3, 256>}, {pipeline_mode = #tpu.pipeline_mode<synchronous>, transform_indices = @transform_1, window_bounds = array<i64: 32, 3>}, {pipeline_mode = #tpu.pipeline_mode<synchronous>, transform_indices = @transform_2, window_bounds = array<i64: 32, 1>}, {pipeline_mode = #tpu.pipeline_mode<synchronous>, transform_indices = @transform_3, window_bounds = array<i64: 32, 1>}, {pipeline_mode = #tpu.pipeline_mode<synchronous>, transform_indices = @transform_4, window_bounds = array<i64: 1, 1>}, {transform_indices = @transform_5, window_bounds = array<i64: 1, 1, 256>}]} {
    %c0 = arith.constant 0 : index
    %c0_0 = arith.constant 0 : index
    %c0_1 = arith.constant 0 : index
    %0 = vector.load %arg2[%c0, %c0_0, %c0_1] : memref<1x3x256xf32, #tpu.memory_space<vmem>>, vector<1x3x256xf32>
    %1 = vector.shape_cast %0 : vector<1x3x256xf32> to vector<3x256xf32>
    %c0_2 = arith.constant 0 : index
    %c0_3 = arith.constant 0 : index
    %2 = vector.load %arg3[%c0_2, %c0_3] : memref<32x3xf32, #tpu.memory_space<vmem>>, vector<32x3xf32>
    %3 = vector.extract_strided_slice %2 {offsets = [0, 0], sizes = [32, 1], strides = [1, 1]} : vector<32x3xf32> to vector<32x1xf32>
    %4 = vector.extract_strided_slice %1 {offsets = [0, 0], sizes = [1, 256], strides = [1, 1]} : vector<3x256xf32> to vector<1x256xf32>
    %5 = vector.broadcast %3 : vector<32x1xf32> to vector<32x256xf32>
    %6 = vector.broadcast %4 : vector<1x256xf32> to vector<32x256xf32>
    %7 = arith.mulf %5, %6 : vector<32x256xf32>
    %8 = vector.extract_strided_slice %2 {offsets = [0, 1], sizes = [32, 1], strides = [1, 1]} : vector<32x3xf32> to vector<32x1xf32>
    %9 = vector.extract_strided_slice %1 {offsets = [1, 0], sizes = [1, 256], strides = [1, 1]} : vector<3x256xf32> to vector<1x256xf32>
    %10 = vector.broadcast %8 : vector<32x1xf32> to vector<32x256xf32>
    %11 = vector.broadcast %9 : vector<1x256xf32> to vector<32x256xf32>
    %12 = arith.mulf %10, %11 : vector<32x256xf32>
    %13 = arith.addf %7, %12 : vector<32x256xf32>
    %14 = vector.extract_strided_slice %2 {offsets = [0, 2], sizes = [32, 1], strides = [1, 1]} : vector<32x3xf32> to vector<32x1xf32>
    %15 = vector.extract_strided_slice %1 {offsets = [2, 0], sizes = [1, 256], strides = [1, 1]} : vector<3x256xf32> to vector<1x256xf32>
    %16 = vector.broadcast %14 : vector<32x1xf32> to vector<32x256xf32>
    %17 = vector.broadcast %15 : vector<1x256xf32> to vector<32x256xf32>
    %18 = arith.mulf %16, %17 : vector<32x256xf32>
    %19 = arith.addf %13, %18 : vector<32x256xf32>
    %c0_4 = arith.constant 0 : index
    %c0_5 = arith.constant 0 : index
    %20 = vector.load %arg4[%c0_4, %c0_5] : memref<32x1xf32, #tpu.memory_space<vmem>>, vector<32x1xf32>
    %21 = vector.broadcast %20 : vector<32x1xf32> to vector<32x256xf32>
    %22 = arith.addf %19, %21 : vector<32x256xf32>
    %cst = arith.constant 0.000000e+00 : f32
    %23 = vector.broadcast %cst : f32 to vector<32x256xf32>
    %24 = arith.maximumf %22, %23 : vector<32x256xf32>
    %c0_6 = arith.constant 0 : index
    %c0_7 = arith.constant 0 : index
    %25 = vector.load %arg5[%c0_6, %c0_7] : memref<32x1xf32, #tpu.memory_space<vmem>>, vector<32x1xf32>
    %26 = vector.broadcast %25 : vector<32x1xf32> to vector<32x256xf32>
    %27 = arith.mulf %24, %26 : vector<32x256xf32>
    %cst_8 = arith.constant dense<0.000000e+00> : vector<256xf32>
    %28 = vector.multi_reduction <add>, %27, %cst_8 [0] : vector<32x256xf32> to vector<256xf32>
    %29 = vector.shape_cast %28 : vector<256xf32> to vector<1x256xf32>
    %c0_9 = arith.constant 0 : index
    %c0_10 = arith.constant 0 : index
    %30 = vector.load %arg6[%c0_9, %c0_10] : memref<1x1xf32, #tpu.memory_space<vmem>>, vector<1x1xf32>
    %31 = vector.broadcast %30 : vector<1x1xf32> to vector<1x256xf32>
    %32 = arith.addf %29, %31 : vector<1x256xf32>
    %c0_11 = arith.constant 0 : index
    %c0_12 = arith.constant 0 : index
    %c0_13 = arith.constant 0 : index
    %33 = vector.load %arg7[%c0_11, %c0_12, %c0_13] : memref<1x1x256xf32, #tpu.memory_space<vmem>>, vector<1x1x256xf32>
    %34 = vector.shape_cast %33 : vector<1x1x256xf32> to vector<1x256xf32>
    %35 = vector.shape_cast %32 : vector<1x256xf32> to vector<1x1x256xf32>
    tpu.vector_store %arg7[%c0_11, %c0_12, %c0_13], %35 {strides = array<i32>} : memref<1x1x256xf32, #tpu.memory_space<vmem>>, vector<1x1x256xf32>,
    return
  }
  func.func @transform_0(%arg0: i32, %arg1: i32) -> (i32, i32, i32) {
    %c0_i32 = arith.constant 0 : i32
    %c0_i32_0 = arith.constant 0 : i32
    return %arg0, %c0_i32, %arg1 : i32, i32, i32
  }
  func.func @transform_1(%arg0: i32, %arg1: i32) -> (i32, i32) {
    %c0_i32 = arith.constant 0 : i32
    %c0_i32_0 = arith.constant 0 : i32
    %c0_i32_1 = arith.constant 0 : i32
    return %c0_i32, %c0_i32_0 : i32, i32
  }
  func.func @transform_2(%arg0: i32, %arg1: i32) -> (i32, i32) {
    %c0_i32 = arith.constant 0 : i32
    %c0_i32_0 = arith.constant 0 : i32
    %c0_i32_1 = arith.constant 0 : i32
    return %c0_i32, %c0_i32_0 : i32, i32
  }
  func.func @transform_3(%arg0: i32, %arg1: i32) -> (i32, i32) {
    %c0_i32 = arith.constant 0 : i32
    %c0_i32_0 = arith.constant 0 : i32
    %c0_i32_1 = arith.constant 0 : i32
    return %c0_i32, %c0_i32_0 : i32, i32
  }
  func.func @transform_4(%arg0: i32, %arg1: i32) -> (i32, i32) {
    %c0_i32 = arith.constant 0 : i32
    %c0_i32_0 = arith.constant 0 : i32
    %c0_i32_1 = arith.constant 0 : i32
    return %c0_i32, %c0_i32_0 : i32, i32
  }
  func.func @transform_5(%arg0: i32, %arg1: i32) -> (i32, i32, i32) {
    %c0_i32 = arith.constant 0 : i32
    %c0_i32_0 = arith.constant 0 : i32
    return %arg0, %c0_i32, %arg1 : i32, i32, i32
  }
}

module attributes {stable_mosaic.version = 11 : i64} {
  func.func @_refine_score_kernel(%arg0: i32, %arg1: memref<8x512xf32, #tpu.memory_space<vmem>>, %arg2: memref<512x64xbf16, #tpu.memory_space<vmem>>, %arg3: memref<1x64xf32, #tpu.memory_space<vmem>>, %arg4: memref<64x128xbf16, #tpu.memory_space<vmem>>, %arg5: memref<1x128xf32, #tpu.memory_space<vmem>>, %arg6: memref<8x128xf32, #tpu.memory_space<vmem>>, %arg7: memref<8x1xf32, #tpu.memory_space<vmem>>) attributes {dimension_semantics = [#tpu.dimension_semantics<parallel>], iteration_bounds = array<i64: 2>, scalar_prefetch = 0 : i64, scratch_operands = 0 : i64, tpu.core_type = #tpu.core_type<tc>, window_params = [{transform_indices = @transform_0, window_bounds = array<i64: 8, 512>}, {pipeline_mode = #tpu.pipeline_mode<synchronous>, transform_indices = @transform_1, window_bounds = array<i64: 512, 64>}, {pipeline_mode = #tpu.pipeline_mode<synchronous>, transform_indices = @transform_2, window_bounds = array<i64: 1, 64>}, {pipeline_mode = #tpu.pipeline_mode<synchronous>, transform_indices = @transform_3, window_bounds = array<i64: 64, 128>}, {pipeline_mode = #tpu.pipeline_mode<synchronous>, transform_indices = @transform_4, window_bounds = array<i64: 1, 128>}, {transform_indices = @transform_5, window_bounds = array<i64: 8, 128>}, {transform_indices = @transform_6, window_bounds = array<i64: 8, 1>}]} {
    %c0 = arith.constant 0 : index
    %c0_0 = arith.constant 0 : index
    %0 = vector.load %arg1[%c0, %c0_0] : memref<8x512xf32, #tpu.memory_space<vmem>>, vector<8x512xf32>
    %1 = arith.truncf %0 : vector<8x512xf32> to vector<8x512xbf16>
    %c0_1 = arith.constant 0 : index
    %c0_2 = arith.constant 0 : index
    %2 = vector.load %arg2[%c0_1, %c0_2] : memref<512x64xbf16, #tpu.memory_space<vmem>>, vector<512x64xbf16>
    %cst = arith.constant dense<0.000000e+00> : vector<8x64xf32>
    %3 = tpu.matmul %1, %2, %cst {dimension_numbers = #tpu.dot_dimension_numbers<[1], [0], [0], [1], [0, 0, 1, 1], [], []>} : vector<8x512xbf16>, vector<512x64xbf16>, vector<8x64xf32> -> vector<8x64xf32>
    %c0_3 = arith.constant 0 : index
    %c0_4 = arith.constant 0 : index
    %4 = vector.load %arg3[%c0_3, %c0_4] : memref<1x64xf32, #tpu.memory_space<vmem>>, vector<1x64xf32>
    %5 = vector.broadcast %4 : vector<1x64xf32> to vector<8x64xf32>
    %6 = arith.addf %3, %5 : vector<8x64xf32>
    %cst_5 = arith.constant 0.000000e+00 : f32
    %7 = vector.broadcast %cst_5 : f32 to vector<8x64xf32>
    %8 = arith.maximumf %6, %7 : vector<8x64xf32>
    %9 = arith.truncf %8 : vector<8x64xf32> to vector<8x64xbf16>
    %c0_6 = arith.constant 0 : index
    %c0_7 = arith.constant 0 : index
    %10 = vector.load %arg4[%c0_6, %c0_7] : memref<64x128xbf16, #tpu.memory_space<vmem>>, vector<64x128xbf16>
    %cst_8 = arith.constant dense<0.000000e+00> : vector<8x128xf32>
    %11 = tpu.matmul %9, %10, %cst_8 {dimension_numbers = #tpu.dot_dimension_numbers<[1], [0], [0], [1], [0, 0, 1, 1], [], []>} : vector<8x64xbf16>, vector<64x128xbf16>, vector<8x128xf32> -> vector<8x128xf32>
    %c0_9 = arith.constant 0 : index
    %c0_10 = arith.constant 0 : index
    %12 = vector.load %arg5[%c0_9, %c0_10] : memref<1x128xf32, #tpu.memory_space<vmem>>, vector<1x128xf32>
    %13 = vector.broadcast %12 : vector<1x128xf32> to vector<8x128xf32>
    %14 = arith.addf %11, %13 : vector<8x128xf32>
    %c0_11 = arith.constant 0 : index
    %c0_12 = arith.constant 0 : index
    %15 = vector.load %arg6[%c0_11, %c0_12] : memref<8x128xf32, #tpu.memory_space<vmem>>, vector<8x128xf32>
    tpu.vector_store %arg6[%c0_11, %c0_12], %14 {strides = array<i32>} : memref<8x128xf32, #tpu.memory_space<vmem>>, vector<8x128xf32>,
    %16 = vector.extract_strided_slice %0 {offsets = [0, 0], sizes = [8, 256], strides = [1, 1]} : vector<8x512xf32> to vector<8x256xf32>
    %17 = vector.extract_strided_slice %0 {offsets = [0, 256], sizes = [8, 256], strides = [1, 1]} : vector<8x512xf32> to vector<8x256xf32>
    %18 = arith.subf %16, %17 : vector<8x256xf32>
    %19 = arith.mulf %18, %18 : vector<8x256xf32>
    %cst_13 = arith.constant dense<0.000000e+00> : vector<8xf32>
    %20 = vector.multi_reduction <add>, %19, %cst_13 [1] : vector<8x256xf32> to vector<8xf32>
    %21 = vector.shape_cast %20 : vector<8xf32> to vector<8x1xf32>
    %cst_14 = arith.constant 0.00520833349 : f32
    %22 = vector.broadcast %cst_14 : f32 to vector<8x1xf32>
    %23 = arith.mulf %21, %22 : vector<8x1xf32>
    %c0_15 = arith.constant 0 : index
    %c0_16 = arith.constant 0 : index
    %24 = vector.load %arg7[%c0_15, %c0_16] : memref<8x1xf32, #tpu.memory_space<vmem>>, vector<8x1xf32>
    tpu.vector_store %arg7[%c0_15, %c0_16], %23 {strides = array<i32>} : memref<8x1xf32, #tpu.memory_space<vmem>>, vector<8x1xf32>,
    return
  }
  func.func @transform_0(%arg0: i32) -> (i32, i32) {
    %c0_i32 = arith.constant 0 : i32
    %c0_i32_0 = arith.constant 0 : i32
    return %arg0, %c0_i32 : i32, i32
  }
  func.func @transform_1(%arg0: i32) -> (i32, i32) {
    %c0_i32 = arith.constant 0 : i32
    %c0_i32_0 = arith.constant 0 : i32
    %c0_i32_1 = arith.constant 0 : i32
    return %c0_i32, %c0_i32_0 : i32, i32
  }
  func.func @transform_2(%arg0: i32) -> (i32, i32) {
    %c0_i32 = arith.constant 0 : i32
    %c0_i32_0 = arith.constant 0 : i32
    %c0_i32_1 = arith.constant 0 : i32
    return %c0_i32, %c0_i32_0 : i32, i32
  }
  func.func @transform_3(%arg0: i32) -> (i32, i32) {
    %c0_i32 = arith.constant 0 : i32
    %c0_i32_0 = arith.constant 0 : i32
    %c0_i32_1 = arith.constant 0 : i32
    return %c0_i32, %c0_i32_0 : i32, i32
  }
  func.func @transform_4(%arg0: i32) -> (i32, i32) {
    %c0_i32 = arith.constant 0 : i32
    %c0_i32_0 = arith.constant 0 : i32
    %c0_i32_1 = arith.constant 0 : i32
    return %c0_i32, %c0_i32_0 : i32, i32
  }
  func.func @transform_5(%arg0: i32) -> (i32, i32) {
    %c0_i32 = arith.constant 0 : i32
    %c0_i32_0 = arith.constant 0 : i32
    return %arg0, %c0_i32 : i32, i32
  }
  func.func @transform_6(%arg0: i32) -> (i32, i32) {
    %c0_i32 = arith.constant 0 : i32
    %c0_i32_0 = arith.constant 0 : i32
    return %arg0, %c0_i32 : i32, i32
  }
}

</mosaic_0001>

<bundles_post_ra>
// kernel: _core.2
= control target key start
LH: loop header
LB: loop body
LE: loop exit
PB: predicated region body
PF: predicated region fallthrough
CT: control target
= control target key end

     0   :  { %s730_s20 = smov 0   ;;  %s732_s21 = smov 0   ;;  %s824_s0 = inlined_call_operand.vmem [shape: f32[2,3,256], index: 0, kind: input, shape index: {}]   ;;  %s825_s1 = inlined_call_operand.vmem [shape: f32[32,3], index: 1, kind: input, shape index: {}]   ;;  %s826_s2 = inlined_call_operand.vmem [shape: f32[32,1], index: 2, kind: input, shape index: {}]   ;;  %s827_s3 = inlined_call_operand.vmem [shape: f32[32,1], index: 3, kind: input, shape index: {}]   ;;  %s828_s4 = inlined_call_operand.<no memory space> [shape: f32[1,1], index: 4, kind: input, shape index: {}]   ;;  %s829_s5 = inlined_call_operand.vmem [shape: f32[2,1,256], index: 5, kind: output, shape index: {}]  }
   0x1   :  { %v10_v0 = vstv %s828_s4  ;;  %s734_s22 = smov 0  }
   0x2   :  { %11 = vst [vmem:[#allocation2] sm:$0x1] %v10_v0 }
   0x3 LB: > { %s29_s4 = sadd.s32 1, %s687_s21  ;;  %p626_p0 = scmp.ge.s32.totalorder %s691_s22, 1  ;;  %s691_s22 = sphi %s734_s22, %s17_s22   ;;  %s687_s21 = sphi %s732_s21, %s831_s21   ;;  %s683_s20 = sphi %s730_s20, %s830_s20  }
   0x4   : > { %p31_p1 = scmp.ge.s32.totalorder %s29_s4, 2  ;;  %p210_p2 = scmp.lt.s32.totalorder %s691_s22, 3 }
   0x6   : > { %s833_s4 = smov (%p31_p1, %s29_s4), 0  ;;  %p211_p3 = pnand %p626_p0, %p210_p2 }
   0x7   : > { %v265_v1 = vld [vmem:[%s825_s1] sm:$0xff] (!%p211_p3)  ;;  %v693_v2 = vmov (!%p211_p3), 2   ;;  %v694_v3 = vmov (!%p211_p3), 1   ;;  %v266_v4 = vld [vmem:[%s825_s1 + $0x8] sm:$0xff] (!%p211_p3)  ;;  %v268_v5 = vld [vmem:[%s825_s1 + $0x18] sm:$0xff] (!%p211_p3)  ;;  %v695_v7 = vmov (!%p211_p3), 0   ;;  %v290_v21 = vlaneseq (!%p211_p3) }
   0x8   : > { %214 = sbr.rel (%p211_p3) target bundleno = 208 (0xd0), region = 40  ;;  %662 = vset.pattern.permute.xlu0 (!%p211_p3), %v693_v2  ;;  %661 = vset.pattern.permute.xlu1 (!%p211_p3), %v694_v3  ;;  %v267_v6 = vld [vmem:[%s825_s1 + $0x10] sm:$0xff] (!%p211_p3)  ;;  %v416_v8 = vld [vmem:[%s826_s2] sm:$0xff] (!%p211_p3)  ;;  %v419_v9 = vld [vmem:[%s826_s2 + $0x18] sm:$0xff] (!%p211_p3)  ;;  %p246_p4 = scmp.lt.s32.totalorder (!%p211_p3), %s683_s20, 1 }
   0x9   : > { %367 = vperm.xlu0 (!%p211_p3), %662, %v265_v1   ;;  %317 = vperm.xlu1 (!%p211_p3), %661, %v265_v1   ;;  %v457_v10 = vld [vmem:[%s827_s3 + $0x8] sm:$0xff] (!%p211_p3)  ;;  %v459_v12 = vld [vmem:[%s827_s3 + $0x18] sm:$0xff] (!%p211_p3)  ;;  %v418_v13 = vld [vmem:[%s826_s2 + $0x10] sm:$0xff] (!%p211_p3)  ;;  %v792_v23 = vshrl.u32 (!%p211_p3), %v290_v21, 7  ;;  %vm538_vm0 = vcmp.lt.s32.totalorder (!%p211_p3), %v290_v21, 256 }
   0xa   : > { %v417_v11 = vld [vmem:[%s826_s2 + $0x8] sm:$0xff] (!%p211_p3)  ;;  %v456_v14 = vld [vmem:[%s827_s3] sm:$0xff] (!%p211_p3)  ;;  %v458_v15 = vld [vmem:[%s827_s3 + $0x10] sm:$0xff] (!%p211_p3) }
   0xb   : > { %v506_v16 = vld [vmem:[#allocation2] sm:$0x1] (!%p211_p3)  ;;  %v798_v25 = vsub.s32 (!%p211_p3), 0, %v792_v23  ;;  %v296_v26 = vsub.s32 (!%p211_p3), 4, %v792_v23  ;;  %v334_v28 = vsub.s32 (!%p211_p3), 1, %v792_v23  ;;  %v338_v29 = vsub.s32 (!%p211_p3), 5, %v792_v23 }
   0xc   : > { %v384_v30 = vsub.s32 (!%p211_p3), 2, %v792_v23  ;;  %v388_v31 = vsub.s32 (!%p211_p3), 6, %v792_v23 }
   0xd   : > { %665 = vset.pattern.permute.xlu0 (!%p211_p3), %v694_v3  ;;  %321 = vperm.xlu1 (!%p211_p3), %661, %v266_v4  }
   0xe   : > { %329 = vperm.xlu0 (!%p211_p3), %665, %v268_v5  }
   0xf   : > { %s835_s20 = smov (!%p246_p4, %s683_s20), 1 }
  0x10   : > { %s632_s25 = sshll.u32 %s835_s20, 3  ;;  %s629_s29 = sshll.u32 %s835_s20, 1 }
  0x11   : > { %325 = vperm.xlu1 %661, %v267_v6   ;;  %s253_s28 = scalar_lea.vmem %s824_s0, %s632_s25  ;;  %s262_s7 = scalar_lea.vmem %s829_s5, %s629_s29 }
  0x12   : > { %666 = vset.pattern.permute.xlu0 %v695_v7  ;;  %v264_v33 = vld [vmem:[%s253_s28] sm:$0x77] }
  0x13   : > { %271 = vperm.xlu0 %666, %v265_v1   ;;  %v293_v34 = vrot.slane %v264_v33, %v798_v25  ;;  %v297_v35 = vrot.slane %v264_v33, %v296_v26  ;;  %v335_v36 = vrot.slane %v264_v33, %v334_v28  ;;  %v339_v37 = vrot.slane %v264_v33, %v338_v29 }
  0x14   : > { %v385_v38 = vrot.slane %v264_v33, %v384_v30  ;;  %v389_v39 = vrot.slane %v264_v33, %v388_v31 }
  0x15   : > { %663 = vset.pattern.permute.xlu1 %v693_v2  ;;  %v303_v41 = vrot.slane %v293_v34, %v798_v25  ;;  %v307_v42 = vrot.slane %v297_v35, %v798_v25  ;;  %v345_v44 = vrot.slane %v335_v36, %v334_v28  ;;  %v349_v45 = vrot.slane %v339_v37, %v334_v28 }
  0x16   : > { %371 = vperm.xlu1 %663, %v266_v4   ;;  %v395_v46 = vrot.slane %v385_v38, %v384_v30  ;;  %v399_v47 = vrot.slane %v389_v39, %v384_v30 }
  0x17   : > { %276 = vperm.xlu0 %666, %v266_v4  }
  0x1a   : > { %664 = vset.pattern.permute.xlu1 %v695_v7 }
  0x1b   : > { %281 = vperm.xlu0 %666, %v267_v6   ;;  %286 = vperm.xlu1 %664, %v268_v5  }
  0x1f   : > { %422 = vperm.xlu0 %666, %v416_v8   ;;  %667 = vset.pattern.permute.xlu1 %v693_v2 }
  0x20   : > { %375 = vperm.xlu1 %667, %v267_v6  }
  0x23   : > { %437 = vperm.xlu0 %666, %v419_v9  }
  0x24   : > { %379 = vperm.xlu1 %667, %v268_v5  }
  0x27   : > { %467 = vperm.xlu0 %666, %v457_v10  }
  0x28   : > { %668 = vset.pattern.permute.xlu1 %v695_v7 }
  0x29   : > { %427 = vperm.xlu1 %668, %v417_v11  }
  0x2b   : > { %477 = vperm.xlu0 %666, %v459_v12  }
  0x2d   : > { %432 = vperm.xlu1 %668, %v418_v13  }
  0x31   : > { %462 = vperm.xlu1 %668, %v456_v14  }
  0x35   : > { %472 = vperm.xlu1 %668, %v458_v15  }
  0x39   : > { %509 = vperm.xlu1 %668, %v506_v16  }
  0x88   : > { %v318_v17 = vpop.permute.xlu1 %317  ;;  %v368_v18 = vpop.permute.xlu0 %367 }
  0x89   : > { %v350_v53 = vmul.f32 %v345_v44, %v318_v17  ;;  %v351_v54 = vmul.f32 %v349_v45, %v318_v17  ;;  %v400_v55 = vmul.f32 %v395_v46, %v368_v18  ;;  %v401_v56 = vmul.f32 %v399_v47, %v368_v18 }
  0x8c   : > { %v322_v19 = vpop.permute.xlu1 %321 }
  0x8d   : > { %v330_v20 = vpop.permute.xlu0 %329  ;;  %v352_v58 = vmul.f32 %v345_v44, %v322_v19  ;;  %v353_v59 = vmul.f32 %v349_v45, %v322_v19 }
  0x8e   : > { %v356_v60 = vmul.f32 %v345_v44, %v330_v20  ;;  %v357_v61 = vmul.f32 %v349_v45, %v330_v20 }
  0x90   : > { %v326_v22 = vpop.permute.xlu1 %325 }
  0x91   : > { %v354_v5 = vmul.f32 %v345_v44, %v326_v22  ;;  %v355_v6 = vmul.f32 %v349_v45, %v326_v22 }
  0x92   : > { %v272_v24 = vpop.permute.xlu0 %271 }
  0x93   : > { %v308_v49 = vmul.f32 %v303_v41, %v272_v24  ;;  %v309_v50 = vmul.f32 %v307_v42, %v272_v24 }
  0x95   : > { %v372_v27 = vpop.permute.xlu1 %371  ;;  %v358_v63 = vadd.f32 %v350_v53, %v308_v49  ;;  %v359_v0 = vadd.f32 %v351_v54, %v309_v50 }
  0x96   : > { %v277_v32 = vpop.permute.xlu0 %276  ;;  %v402_v9 = vmul.f32 %v395_v46, %v372_v27  ;;  %v403_v10 = vmul.f32 %v399_v47, %v372_v27 }
  0x97   : > { %v310_v51 = vmul.f32 %v303_v41, %v277_v32  ;;  %v311_v52 = vmul.f32 %v307_v42, %v277_v32  ;;  %v408_v15 = vadd.f32 %v400_v55, %v358_v63  ;;  %v409_v16 = vadd.f32 %v401_v56, %v359_v0 }
  0x99   : > { %v360_v3 = vadd.f32 %v352_v58, %v310_v51  ;;  %v361_v4 = vadd.f32 %v353_v59, %v311_v52 }
  0x9a   : > { %v287_v40 = vpop.permute.xlu1 %286  ;;  %v282_v43 = vpop.permute.xlu0 %281 }
  0x9b   : > { %v314_v1 = vmul.f32 %v303_v41, %v287_v40  ;;  %v315_v2 = vmul.f32 %v307_v42, %v287_v40  ;;  %v312_v11 = vmul.f32 %v303_v41, %v282_v43  ;;  %v313_v12 = vmul.f32 %v307_v42, %v282_v43 }
  0x9c   : > { %v410_v24 = vadd.f32 %v402_v9, %v360_v3  ;;  %v411_v26 = vadd.f32 %v403_v10, %v361_v4 }
  0x9d   : > { %v364_v13 = vadd.f32 %v356_v60, %v314_v1  ;;  %v365_v14 = vadd.f32 %v357_v61, %v315_v2  ;;  %v362_v31 = vadd.f32 %v354_v5, %v312_v11  ;;  %v363_v32 = vadd.f32 %v355_v6, %v313_v12 }
  0x9e   : > { %v423_v57 = vpop.permute.xlu0 %422 }
  0x9f   : > { %v376_v48 = vpop.permute.xlu1 %375  ;;  %v440_v28 = vadd.f32 %v423_v57, %v408_v15  ;;  %v441_v29 = vadd.f32 %v423_v57, %v409_v16 }
  0xa0   : > { %v404_v19 = vmul.f32 %v395_v46, %v376_v48  ;;  %v405_v20 = vmul.f32 %v399_v47, %v376_v48 }
  0xa1   : > { %v448_v37 = vmax.f32 %v440_v28, 0.0  ;;  %v449_v38 = vmax.f32 %v441_v29, 0.0 }
  0xa2   : > { %v438_v17 = vpop.permute.xlu0 %437  ;;  %v412_v35 = vadd.f32 %v404_v19, %v362_v31  ;;  %v413_v36 = vadd.f32 %v405_v20, %v363_v32 }
  0xa3   : > { %v380_v62 = vpop.permute.xlu1 %379 }
  0xa4   : > { %v406_v7 = vmul.f32 %v395_v46, %v380_v62  ;;  %v407_v8 = vmul.f32 %v399_v47, %v380_v62 }
  0xa6   : > { %v414_v30 = vadd.f32 %v406_v7, %v364_v13  ;;  %v415_v22 = vadd.f32 %v407_v8, %v365_v14  ;;  %v468_v39 = vpop.permute.xlu0 %467  ;;  %v696_v7 = vmov 1966171168  }
  0xa7   : > { %v522_v8 = vunpack.c.l.s4 %v696_v7 }
  0xa8   : > { %v428_v18 = vpop.permute.xlu1 %427  ;;  %v446_v40 = vadd.f32 %v438_v17, %v414_v30  ;;  %v447_v41 = vadd.f32 %v438_v17, %v415_v22 }
  0xa9   : > { %v442_v33 = vadd.f32 %v428_v18, %v410_v24  ;;  %v443_v27 = vadd.f32 %v428_v18, %v411_v26  ;;  %v523_v14 = vunpack.c.0.s8 %v522_v8 }
  0xaa   : > { %v454_v49 = vmax.f32 %v446_v40, 0.0  ;;  %v455_v50 = vmax.f32 %v447_v41, 0.0  ;;  %v478_v55 = vpop.permute.xlu0 %477 }
  0xab   : > { %v450_v42 = vmax.f32 %v442_v33, 0.0  ;;  %v451_v43 = vmax.f32 %v443_v27, 0.0  ;;  %v526_v20 = vsub.s32 %v523_v14, %v792_v23 }
  0xac   : > { %v433_v34 = vpop.permute.xlu1 %432  ;;  %v486_v61 = vmul.f32 %v478_v55, %v454_v49  ;;  %v487_v62 = vmul.f32 %v478_v55, %v455_v50 }
  0xad   : > { %v444_v44 = vadd.f32 %v433_v34, %v412_v35  ;;  %v445_v45 = vadd.f32 %v433_v34, %v413_v36  ;;  %v482_v51 = vmul.f32 %v468_v39, %v450_v42  ;;  %v483_v52 = vmul.f32 %v468_v39, %v451_v43 }
  0xaf   : > { %v452_v53 = vmax.f32 %v444_v44, 0.0  ;;  %v453_v54 = vmax.f32 %v445_v45, 0.0 }
  0xb0   : > { %v463_v46 = vpop.permute.xlu1 %462 }
  0xb1   : > { %v480_v47 = vmul.f32 %v463_v46, %v448_v37  ;;  %v481_v48 = vmul.f32 %v463_v46, %v449_v38 }
  0xb3   : > { %v488_v57 = vadd.f32 %v482_v51, %v480_v47  ;;  %v497_v58 = vadd.f32 %v483_v52, %v481_v48 }
  0xb4   : > { %v473_v56 = vpop.permute.xlu1 %472 }
  0xb5   : > { %v484_v59 = vmul.f32 %v473_v56, %v452_v53  ;;  %v485_v60 = vmul.f32 %v473_v56, %v453_v54 }
  0xb7   : > { %v489_v63 = vadd.f32 %v488_v57, %v484_v59  ;;  %v498_v0 = vadd.f32 %v497_v58, %v485_v60 }
  0xb8   : > { %v510_v13 = vpop.permute.xlu1 %509 }
  0xb9   : > { %v490_v1 = vadd.f32 %v489_v63, %v486_v61  ;;  %v499_v2 = vadd.f32 %v498_v0, %v487_v62  ;;  %v515_v19 = vrot.slane %v510_v13, %v798_v25 }
  0xbb   : > { %v491_v3 = vrot.slane %v490_v1, 4  ;;  %v500_v4 = vrot.slane %v499_v2, 4 }
  0xbd   : > { %v492_v5 = vadd.f32 %v491_v3, %v490_v1  ;;  %v501_v6 = vadd.f32 %v500_v4, %v499_v2 }
  0xbf   : > { %v493_v9 = vrot.slane %v492_v5, 2  ;;  %v502_v10 = vrot.slane %v501_v6, 2 }
  0xc1   : > { %v494_v11 = vadd.f32 %v493_v9, %v492_v5  ;;  %v503_v12 = vadd.f32 %v502_v10, %v501_v6 }
  0xc3   : > { %v495_v15 = vrot.slane %v494_v11, 1  ;;  %v504_v16 = vrot.slane %v503_v12, 1 }
  0xc5   : > { %v496_v17 = vadd.f32 %v495_v15, %v494_v11  ;;  %v505_v18 = vadd.f32 %v504_v16, %v503_v12 }
  0xc7   : > { %v516_v24 = vadd.f32 %v515_v19, %v496_v17  ;;  %v517_v26 = vadd.f32 %v515_v19, %v505_v18 }
  0xc9   : > { %v520_v28 = vcombine.low %v516_v24, %v517_v26 }
  0xcb   : > { %v527_v29 = vrot.slane %v520_v28, %v526_v20 }
  0xcd   : > { %v534_v30 = vrot.slane %v527_v29, %v526_v20 }
  0xcf   : > { %540 = vst.msk [vmem:[%s262_s7] sm:$0x3] %vm538_vm0, %v534_v30 }
  0xd0 PF: > { %s17_s22 = sadd.s32 1, %s691_s22   ;;  %s830_s20 = smov %s687_s21 }
  0xd1   : > { %p14_p5 = scmp.ge.s32.totalorder %s17_s22, 4   ;;  %s831_s21 = smov %s833_s4 }
  0xd3   :  { %16 = sbr.rel (!%p14_p5) target bundleno = 3 (0x3), region = 70 }

// kernel: squeeze.4
= control target key start
LH: loop header
LB: loop body
LE: loop exit
PB: predicated region body
PF: predicated region fallthrough
CT: control target
= control target key end

     0   :  { %vm7_vm0 = vcmask 31744   ;;  %s43_s8 = smov 116   ;;  %s44_s9 = smov 120   ;;  %s68_s0 = inlined_call_operand.vmem [shape: f32[16], index: 0, kind: input, shape index: {}]   ;;  %s69_s1 = inlined_call_operand.vmem [shape: f32[2,2,4], index: 1, kind: output, shape index: {}]  }
   0x1   :  { %v4_v0 = vld [vmem:[%s68_s0] sm:$0x1]  ;;  %s42_s0 = smov 124  }
   0x2   :  { %5 = vst [vmem:[#allocation1] sm:$0x1] %v4_v0 }
   0x9   :  { %v9_v1 = vld [vmem:[#allocation1] sm:$0x1]  }
   0xa   :  { %v21_v2 = vld [vmem:[#allocation1] sm:$0x1]   ;;  %10 = vrot.lane.b32.xlu0 %v9_v1, %s42_s0 }
   0xb   :  { %22 = vrot.lane.b32.xlu1 %v21_v2, %s43_s8  ;;  %v6_v3 = vld [vmem:[#allocation1] sm:$0x1]  }
   0xc   :  { %v15_v4 = vld [vmem:[#allocation1] sm:$0x1]   ;;  %8 = vst.msk [vmem:[#allocation0] sm:$0x1] %vm7_vm0, %v6_v3  }
   0xe   :  { %16 = vrot.lane.b32.xlu0 %v15_v4, %s44_s9 }
  0x7c   :  { %v11_v5 = vpop.permute.xlu0 %10  }
  0x7d   :  { %v23_v6 = vpop.permute.xlu1 %22   ;;  %14 = vst.msk [vmem:[#allocation0 + $0x1] sm:$0x1] %vm7_vm0, %v11_v5  }
  0x7e   :  { %26 = vst.msk [vmem:[#allocation0 + $0x9] sm:$0x1] %vm7_vm0, %v23_v6  }
  0x80   :  { %v17_v7 = vpop.permute.xlu0 %16  }
  0x81   :  { %20 = vst.msk [vmem:[#allocation0 + $0x8] sm:$0x1] %vm7_vm0, %v17_v7  }
  0x84   :  { %v30_v8 = vld [vmem:[#allocation0] sm:$0x3] }
  0x85   :  { %32 = vst [vmem:[%s69_s1] sm:$0x3] %v30_v8 }
  0x88   :  { %v34_v9 = vld [vmem:[#allocation0 + $0x8] sm:$0x3] }
  0x89   :  { %38 = vst [vmem:[%s69_s1 + $0x2] sm:$0x3] %v34_v9 }

// kernel: _core.3
= control target key start
LH: loop header
LB: loop body
LE: loop exit
PB: predicated region body
PF: predicated region fallthrough
CT: control target
= control target key end

     0   :  { %s996_s21 = smov 0   ;;  %s1138_s0 = inlined_call_operand.vmem [shape: f32[16,512], index: 0, kind: input, shape index: {}]   ;;  %s1139_s1 = inlined_call_operand.vmem [shape: bf16[512,64], index: 1, kind: input, shape index: {}]   ;;  %s1140_s2 = inlined_call_operand.vmem [shape: f32[1,64], index: 2, kind: input, shape index: {}]   ;;  %s1141_s3 = inlined_call_operand.vmem [shape: bf16[64,128], index: 3, kind: input, shape index: {}]   ;;  %s1142_s4 = inlined_call_operand.vmem [shape: f32[1,128], index: 4, kind: input, shape index: {}]   ;;  %s1143_s5 = inlined_call_operand.vmem [shape: f32[16,128], index: 5, kind: output, shape index: {0}]   ;;  %s1144_s6 = inlined_call_operand.vmem [shape: f32[16,1], index: 6, kind: output, shape index: {1}]  }
   0x1 LB: > { %s793_s22 = sadd.s32 4294967295, %s957_s21   ;;  %p797_p0 = scmp.ge.s32.totalorder %s957_s21, 1  ;;  %s957_s21 = sphi %s996_s21, %s17_s21  }
   0x2   : > { %p215_p1 = scmp.lt.s32.totalorder %s957_s21, 3 }
   0x4   : > { %p216_p2 = pnand %p797_p0, %p215_p1 }
   0x5   : > { %v915_v0 = vld [vmem:[%s1139_s1 + $0x40] sm:$0xff] (!%p216_p2)   ;;  %v919_v4 = vld [vmem:[%s1139_s1 + $0x48] sm:$0xff] (!%p216_p2)   ;;  %v923_v8 = vld [vmem:[%s1139_s1 + $0x50] sm:$0xff] (!%p216_p2)   ;;  %p248_p3 = scmp.lt.s32.totalorder (!%p216_p2), %s793_s22, 1  ;;  %v959_v41 = vmov (!%p216_p2), 0.0   ;;  %vm960_vm0 = vmmov (!%p216_p2), 0  }
   0x6   : > { %219 = sbr.rel (%p216_p2) target bundleno = 477 (0x1dd), region = 40  ;;  %v916_v1 = vld [vmem:[%s1139_s1 + $0xc0] sm:$0xff] (!%p216_p2)   ;;  %844 = vmatprep.subr.bf16.mxu0 (!%p216_p2), %v915_v0  ;;  %v920_v5 = vld [vmem:[%s1139_s1 + $0xc8] sm:$0xff] (!%p216_p2)   ;;  %v924_v9 = vld [vmem:[%s1139_s1 + $0xd0] sm:$0xff] (!%p216_p2)   ;;  %vm654_vm1 = vcmask (!%p216_p2), 523264   ;;  %vm707_vm2 = vcmask (!%p216_p2), 7168  }
   0x7   : > { %v917_v2 = vld [vmem:[%s1139_s1] sm:$0xff] (!%p216_p2)   ;;  %866 = vmatprep.subr.bf16.mxu1 (!%p216_p2), %v916_v1  ;;  %v921_v6 = vld [vmem:[%s1139_s1 + $0x8] sm:$0xff] (!%p216_p2)   ;;  %v925_v10 = vld [vmem:[%s1139_s1 + $0x10] sm:$0xff] (!%p216_p2)  }
   0x8   : > { %v918_v3 = vld [vmem:[%s1139_s1 + $0x80] sm:$0xff] (!%p216_p2)   ;;  %845 = vmatpush3.bf16.msra.mxu0 (!%p216_p2), %v917_v2  ;;  %v922_v7 = vld [vmem:[%s1139_s1 + $0x88] sm:$0xff] (!%p216_p2)   ;;  %v926_v11 = vld [vmem:[%s1139_s1 + $0x90] sm:$0xff] (!%p216_p2)  }
   0x9   : > { %867 = vmatpush3.bf16.msra.mxu1 (!%p216_p2), %v918_v3  ;;  %846 = vmatprep.subr.bf16.mxu0 (!%p216_p2), %v919_v4  ;;  %v927_v12 = vld [vmem:[%s1139_s1 + $0x58] sm:$0xff] (!%p216_p2)   ;;  %v931_v16 = vld [vmem:[%s1139_s1 + $0x60] sm:$0xff] (!%p216_p2)   ;;  %v935_v20 = vld [vmem:[%s1139_s1 + $0x68] sm:$0xff] (!%p216_p2)  }
   0xa   : > { %868 = vmatprep.subr.bf16.mxu1 (!%p216_p2), %v920_v5  ;;  %v928_v13 = vld [vmem:[%s1139_s1 + $0xd8] sm:$0xff] (!%p216_p2)   ;;  %v932_v17 = vld [vmem:[%s1139_s1 + $0xe0] sm:$0xff] (!%p216_p2)   ;;  %v936_v21 = vld [vmem:[%s1139_s1 + $0xe8] sm:$0xff] (!%p216_p2)  }
   0xb   : > { %v929_v14 = vld [vmem:[%s1139_s1 + $0x18] sm:$0xff] (!%p216_p2)   ;;  %v933_v18 = vld [vmem:[%s1139_s1 + $0x20] sm:$0xff] (!%p216_p2)   ;;  %v937_v22 = vld [vmem:[%s1139_s1 + $0x28] sm:$0xff] (!%p216_p2)  }
   0xc   : > { %847 = vmatpush3.bf16.msra.mxu0 (!%p216_p2), %v921_v6  ;;  %v930_v15 = vld [vmem:[%s1139_s1 + $0x98] sm:$0xff] (!%p216_p2)   ;;  %v934_v19 = vld [vmem:[%s1139_s1 + $0xa0] sm:$0xff] (!%p216_p2)   ;;  %v938_v23 = vld [vmem:[%s1139_s1 + $0xa8] sm:$0xff] (!%p216_p2)  }
   0xd   : > { %869 = vmatpush3.bf16.msra.mxu1 %v922_v7  ;;  %848 = vmatprep.subr.bf16.mxu0 %v923_v8  ;;  %s1146_s22 = smov (!%p248_p3, %s793_s22), 1  ;;  %v939_v24 = vld [vmem:[%s1139_s1 + $0x70] sm:$0xff]   ;;  %v943_v28 = vld [vmem:[%s1139_s1 + $0x78] sm:$0xff]   ;;  %v947_v42 = vld [vmem:[%s1141_s3] sm:$0xff]  }
   0xe   : > { %870 = vmatprep.subr.bf16.mxu1 %v924_v9  ;;  %v940_v25 = vld [vmem:[%s1139_s1 + $0xf0] sm:$0xff]   ;;  %s843_s9 = sshll.u32 %s1146_s22, 5  ;;  %v944_v29 = vld [vmem:[%s1139_s1 + $0xf8] sm:$0xff]   ;;  %v948_v43 = vld [vmem:[%s1141_s3 + $0x8] sm:$0xff]   ;;  %s800_s11 = sshll.u32 %s1146_s22, 3 }
   0xf   : > { %v941_v26 = vld [vmem:[%s1139_s1 + $0x30] sm:$0xff]   ;;  %s252_s18 = scalar_lea.vmem %s1138_s0, %s843_s9  ;;  %v945_v30 = vld [vmem:[%s1139_s1 + $0x38] sm:$0xff]   ;;  %v802_v52 = vld [vmem:[%s1140_s2] ss:$0 sm:$0xff]  ;;  %s260_s14 = scalar_lea.vmem %s1144_s6, %s800_s11 }
  0x10   : > { %849 = vmatpush3.bf16.msra.mxu0 %v925_v10  ;;  %v942_v27 = vld [vmem:[%s1139_s1 + $0xb0] sm:$0xff]   ;;  %v946_v31 = vld [vmem:[%s1139_s1 + $0xb8] sm:$0xff]   ;;  %v263_v32 = vld [vmem:[%s252_s18 + $0x8] sm:$0xff]  ;;  %s256_s19 = scalar_lea.vmem %s1143_s5, %s800_s11 }
  0x11   : > { %871 = vmatpush3.bf16.msra.mxu1 %v926_v11  ;;  %850 = vmatprep.subr.bf16.mxu0 %v927_v12  ;;  %v265_v33 = vld [vmem:[%s252_s18 + $0x18] sm:$0xff]  ;;  %v262_v34 = vld [vmem:[%s252_s18] sm:$0xff]  ;;  %v267_v35 = vpack.c.bf16 %v263_v32, %v263_v32  ;;  %v264_v39 = vld [vmem:[%s252_s18 + $0x10] sm:$0xff] }
  0x12   : > { %872 = vmatprep.subr.bf16.mxu1 %v928_v13  ;;  %v269_v36 = vpack.c.bf16 %v265_v33, %v265_v33  ;;  %v700_v37 = vsub.f32 %v263_v32, %v265_v33  ;;  %v266_v38 = vpack.c.bf16 %v262_v34, %v262_v34  ;;  %v268_v40 = vpack.c.bf16 %v264_v39, %v264_v39  ;;  %v949_v44 = vld [vmem:[%s1141_s3 + $0x10] sm:$0xff]   ;;  %v950_v45 = vld [vmem:[%s1141_s3 + $0x18] sm:$0xff]   ;;  %v835_v3 = vld [vmem:[%s1142_s4] ss:$0 sm:$0xff] }
  0x13   : > { %565 = vmatprep.mubr.bf16.mxu0 %v267_v35  ;;  %v699_v46 = vsub.f32 %v262_v34, %v264_v39 }
  0x14   : > { %851 = vmatpush3.bf16.msra.mxu0 %v929_v14  ;;  %605 = vmatprep.mubr.bf16.mxu1 %v269_v36  ;;  %v702_v47 = vmul.f32 %v700_v37, %v700_v37 }
  0x15   : > { %873 = vmatpush3.bf16.msra.mxu1 %v930_v15  ;;  %852 = vmatprep.subr.bf16.mxu0 %v931_v16  ;;  %v701_v48 = vmul.f32 %v699_v46, %v699_v46 }
  0x16   : > { %874 = vmatprep.subr.bf16.mxu1 %v932_v17 }
  0x17   : > { %v703_v49 = vadd.f32 %v702_v47, %v701_v48 }
  0x18   : > { %853 = vmatpush3.bf16.msra.mxu0 %v933_v18 }
  0x19   : > { %875 = vmatpush3.bf16.msra.mxu1 %v934_v19  ;;  %854 = vmatprep.subr.bf16.mxu0 %v935_v20 }
  0x1a   : > { %876 = vmatprep.subr.bf16.mxu1 %v936_v21  ;;  %704 = vadd.xlane.f32.xlu0 %v703_v49 }
  0x1c   : > { %855 = vmatpush3.bf16.msra.mxu0 %v937_v22 }
  0x1d   : > { %877 = vmatpush3.bf16.msra.mxu1 %v938_v23  ;;  %856 = vmatprep.subr.bf16.mxu0 %v939_v24 }
  0x1e   : > { %878 = vmatprep.subr.bf16.mxu1 %v940_v25 }
  0x20   : > { %857 = vmatpush3.bf16.msra.mxu0 %v941_v26 }
  0x21   : > { %879 = vmatpush3.bf16.msra.mxu1 %v942_v27  ;;  %858 = vmatprep.subr.bf16.mxu0 %v943_v28 }
  0x22   : > { %880 = vmatprep.subr.bf16.mxu1 %v944_v29 }
  0x24   : > { %859 = vmatpush3.bf16.msra.mxu0 %v945_v30 }
  0x25   : > { %881 = vmatpush3.bf16.msra.mxu1 %v946_v31  ;;  %893 = vmatprep.subr.bf16.mxu0 %v959_v41 }
  0x27   : > { %566 = vmatmul.mubr.bf16.vlgmr.msra.gmra.mrb[0].mxu0 %v266_v38 }
  0x28   : > { %606 = vmatmul.mubr.bf16.vlgmr.msra.gmra.mrb[0].mxu1 %v268_v40  ;;  %894 = vmatpush3.bf16.msra.mxu0 %v947_v42 }
  0x29   : > { %895 = vmatprep.subr.bf16.mxu0 %v959_v41  ;;  %901 = vmatprep.mubr.msk.bf16.mxu0 %vm960_vm0, %v959_v41 }
  0x2c   : > { %896 = vmatpush3.bf16.msra.mxu0 %v948_v43 }
  0x2d   : > { %897 = vmatprep.subr.bf16.mxu0 %v959_v41 }
  0x30   : > { %898 = vmatpush3.bf16.msra.mxu0 %v949_v44 }
  0x31   : > { %899 = vmatprep.subr.bf16.mxu0 %v959_v41 }
  0x34   : > { %900 = vmatpush3.bf16.msra.mxu0 %v950_v45 }
  0xa7   : > { %v705_v1 = vpop.xlane.xlu0 %704 }
  0xa8   : > { %v706_v2 = vmul.f32 0.0052083335, %v705_v1 }
  0xaa   : > { %708 = vst.msk [vmem:[%s260_s14] sm:$0xff] %vm707_vm2, %v706_v2 }
  0xfa   : > { %v860_v50 = vpop.f32.mrb[0].mxu0 }
  0xfb   : > { %v882_v51 = vpop.f32.mrb[0].mxu1  ;;  %v861_v53 = vpop.f32.mrb[1].mxu0 }
  0xfc   : > { %v883_v54 = vpop.f32.mrb[1].mxu1  ;;  %v862_v55 = vadd.f32 %v861_v53, %v860_v50  ;;  %v863_v57 = vpop.f32.mrb[2].mxu0 }
  0xfd   : > { %v884_v56 = vadd.f32 %v883_v54, %v882_v51  ;;  %v885_v58 = vpop.f32.mrb[2].mxu1  ;;  %v864_v59 = vpop.f32.mrb[3].mxu0 }
  0xfe   : > { %v886_v60 = vpop.f32.mrb[3].mxu1  ;;  %v568_v61 = vadd.f32 %v862_v55, %v802_v52 }
 0x100   : > { %v608_v62 = vadd.f32 %v884_v56, %v568_v61 }
 0x102   : > { %v613_v63 = vmax.f32 %v608_v62, 0.0 }
 0x104   : > { %v614_v0 = vpack.c.bf16 %v613_v63, %v613_v63 }
 0x106   : > { %902 = vmatmul.mubr.msk.bf16.vlgmr.msra.gmra.mrb[4].mxu0 %vm654_vm1, %v614_v0 }
 0x1d9   : > { %v692_v4 = vpop.f32.mrb[4].mxu0 }
 0x1da   : > { %v693_v5 = vadd.f32 %v835_v3, %v692_v4  ;;  %v903_v6 = vpop.f32.mrb[5].mxu0 }
 0x1db   : > { %v695_v7 = vpop.f32.mrb[6].mxu0 }
 0x1dc   : > { %698 = vst [vmem:[%s256_s19] sm:$0xff] %v693_v5  ;;  %v904_v8 = vpop.f32.mrb[7].mxu0 }
 0x1dd PF: > { %s17_s21 = sadd.s32 1, %s957_s21  }
 0x1de   : > { %p14_p4 = scmp.ge.s32.totalorder %s17_s21, 4  }
 0x1e0   :  { %16 = sbr.rel (!%p14_p4) target bundleno = 1 (0x1), region = 82 }

</bundles_post_ra>
